<compile_context>
chip_gen: v7x
topology: tpu7x:2x2x1
jax: 0.10.0
libtpu: 0.0.40
codegen_flags: <defaults>
</compile_context>

<pallas_src>
import jax
import jax.numpy as jnp
import numpy as np
from jax.experimental import pallas as pl
from jax.experimental.pallas import tpu as pltpu

PE_NORM = 10000.0


def _positional_encoding(max_len: int, embed_size: int) -> jnp.ndarray:
    """Same construction as the torch PositionalEncoding buffer (max_len, embed)."""
    position = np.arange(max_len, dtype=np.float32)[:, None]                     # (M, 1)
    div_term = np.exp(np.arange(0, embed_size, 2, dtype=np.float32)
                      * -(np.log(PE_NORM) / embed_size))                          # (E/2,)
    pe = np.zeros((max_len, embed_size), dtype=np.float32)
    pe[:, 0::2] = np.sin(position * div_term)
    pe[:, 1::2] = np.cos(position * div_term)
    return jnp.asarray(pe)


def _embedding_kernel(pot_ref, conf_ref, w_ref, basis_ref, pot_add_ref,
                      conf_add_ref, out_ref):
    # pot_ref      : (SB, 1)    potential per (site, batch) row
    # conf_ref     : (SB, C)    site-config features, C small (=2)
    # w_ref        : (C, EP)    linear weight rows, zero-padded to EP=128 lanes
    # basis_ref    : (SB, EP)   potential basis (per-site, repeated over batch), padded
    # pot_add_ref  : (SB, EP)   positional encoding (repeated over batch), padded
    # conf_add_ref : (SB, EP)   positional encoding + linear bias, padded
    # out_ref      : (2, SB, EP) stacked output slab; lane dim = 128 -> unmasked stores
    pot = pot_ref[...]                    # (SB, 1)
    conf = conf_ref[...]                  # (SB, C)
    w = w_ref[...]                        # (C, EP)

    # Stream 0: potentials * basis + PE   (pure VPU FMA)
    pot_out = pot * basis_ref[...] + pot_add_ref[...]

    # Stream 1: Linear(configs) + PE, unrolled over the tiny C contraction.
    # No MXU: C=2 would waste the systolic array and pay MRF/MRB latency.
    conf_out = conf_add_ref[...]          # PE + bias, fused at init
    for c in range(conf.shape[1]):        # static unroll (C = 2)
        conf_out = conf_out + conf[:, c:c + 1] * w[c:c + 1, :]

    out_ref[0] = pot_out
    out_ref[1] = conf_out


def make_embedding_fn(weight, bias, potential_basis, pe_table, seq_len, batch):
    """One-time setup: precompute padded / fused parameter tensors and return a
    jitted forward(potentials, configs) -> (pot_emb, conf_emb), each (S, B, E)."""
    E, C = weight.shape
    S, B = seq_len, batch
    SB = S * B
    EP = ((E + 127) // 128) * 128         # pad embed dim to a multiple of 128 lanes

    # --- one-time parameter prep (hoisted out of the per-call path) ---
    w_pad = jnp.zeros((C, EP), jnp.float32).at[:, :E].set(weight.T)          # (C, EP)
    basis_s = potential_basis[:, :S].T                                        # (S, E)
    basis_rep = jnp.zeros((SB, EP), jnp.float32).at[:, :E].set(
        jnp.repeat(basis_s, B, axis=0))                                       # (SB, EP)
    pe_rep = jnp.zeros((SB, EP), jnp.float32).at[:, :E].set(
        jnp.repeat(pe_table[:S, :], B, axis=0))                               # (SB, EP)
    conf_add = pe_rep.at[:, :E].add(bias[None, :])                            # PE + bias
    pot_add = pe_rep

    vmem = pltpu.MemorySpace.VMEM
    kernel = pl.pallas_call(
        _embedding_kernel,
        out_shape=jax.ShapeDtypeStruct((2, SB, EP), jnp.float32),
        in_specs=[pl.BlockSpec(memory_space=vmem)] * 6,
        out_specs=pl.BlockSpec(memory_space=vmem),
    )

    @jax.jit
    def forward(potentials, configs):
        # potentials: (S, B); configs: (S, B, C) -> ((S, B, E), (S, B, E))
        pot2d = potentials.reshape(SB, 1)        # free metadata reshape
        conf2d = configs.reshape(SB, C)          # free metadata reshape
        out = kernel(pot2d, conf2d, w_pad, basis_rep, pot_add, conf_add)
        out = out[:, :, :E].reshape(2, S, B, E)  # strip lane padding, split streams
        return out[0], out[1]

    return forward


if __name__ == "__main__":
    # module hyper-params
    SITE_CONFIGS = 2
    EMBED_SIZE = 32
    MAX_CHAIN_LEN = 128
    # input sizes
    SEQ_LEN = 8
    BATCH = 2

    key = jax.random.PRNGKey(0)
    k_w, k_b, k_basis, k_pot, k_conf = jax.random.split(key, 5)

    # nn.Linear(site_configs, embed_size) init (uniform +-1/sqrt(fan_in)), deterministic
    bound = 1.0 / np.sqrt(SITE_CONFIGS)
    weight = jax.random.uniform(k_w, (EMBED_SIZE, SITE_CONFIGS),
                                minval=-bound, maxval=bound, dtype=jnp.float32)
    bias = jax.random.uniform(k_b, (EMBED_SIZE,),
                              minval=-bound, maxval=bound, dtype=jnp.float32)
    potential_basis = jax.random.normal(k_basis, (EMBED_SIZE, MAX_CHAIN_LEN),
                                        dtype=jnp.float32)
    pe_table = _positional_encoding(MAX_CHAIN_LEN, EMBED_SIZE)

    potentials = jax.random.normal(k_pot, (SEQ_LEN, BATCH), dtype=jnp.float32)
    configs = jax.random.normal(k_conf, (SEQ_LEN, BATCH, SITE_CONFIGS),
                                dtype=jnp.float32)

    embedding = make_embedding_fn(weight, bias, potential_basis, pe_table,
                                  SEQ_LEN, BATCH)
    out_pot, out_conf = jax.block_until_ready(embedding(potentials, configs))

    # pure-JAX reference check
    pe_b = pe_table[:SEQ_LEN][:, None, :]
    ref_pot = potentials[:, :, None] * potential_basis[:, :SEQ_LEN].T[:, None, :] + pe_b
    ref_conf = jnp.einsum('sbc,ec->sbe', configs, weight) + bias + pe_b
    np.testing.assert_allclose(np.asarray(out_pot), np.asarray(ref_pot),
                               rtol=1e-5, atol=1e-5)
    np.testing.assert_allclose(np.asarray(out_conf), np.asarray(ref_conf),
                               rtol=1e-5, atol=1e-5)

    print("KERNEL_OK")
</pallas_src>

<mosaic_0001>
module attributes {stable_mosaic.version = 11 : i64} {
  func.func @_embedding_kernel(%arg0: memref<16x1xf32, #tpu.memory_space<vmem>>, %arg1: memref<16x2xf32, #tpu.memory_space<vmem>>, %arg2: memref<2x128xf32, #tpu.memory_space<vmem>>, %arg3: memref<16x128xf32, #tpu.memory_space<vmem>>, %arg4: memref<16x128xf32, #tpu.memory_space<vmem>>, %arg5: memref<16x128xf32, #tpu.memory_space<vmem>>, %arg6: memref<2x16x128xf32, #tpu.memory_space<vmem>>) attributes {dimension_semantics = [], scalar_prefetch = 0 : i64, scratch_operands = 0 : i64, tpu.core_type = #tpu.core_type<tc>} {
    %c0 = arith.constant 0 : index
    %c0_0 = arith.constant 0 : index
    %0 = vector.load %arg0[%c0, %c0_0] : memref<16x1xf32, #tpu.memory_space<vmem>>, vector<16x1xf32>
    %c0_1 = arith.constant 0 : index
    %c0_2 = arith.constant 0 : index
    %1 = vector.load %arg1[%c0_1, %c0_2] : memref<16x2xf32, #tpu.memory_space<vmem>>, vector<16x2xf32>
    %c0_3 = arith.constant 0 : index
    %c0_4 = arith.constant 0 : index
    %2 = vector.load %arg2[%c0_3, %c0_4] : memref<2x128xf32, #tpu.memory_space<vmem>>, vector<2x128xf32>
    %c0_5 = arith.constant 0 : index
    %c0_6 = arith.constant 0 : index
    %3 = vector.load %arg3[%c0_5, %c0_6] : memref<16x128xf32, #tpu.memory_space<vmem>>, vector<16x128xf32>
    %4 = vector.broadcast %0 : vector<16x1xf32> to vector<16x128xf32>
    %5 = arith.mulf %4, %3 : vector<16x128xf32>
    %c0_7 = arith.constant 0 : index
    %c0_8 = arith.constant 0 : index
    %6 = vector.load %arg4[%c0_7, %c0_8] : memref<16x128xf32, #tpu.memory_space<vmem>>, vector<16x128xf32>
    %7 = arith.addf %5, %6 : vector<16x128xf32>
    %c0_9 = arith.constant 0 : index
    %c0_10 = arith.constant 0 : index
    %8 = vector.load %arg5[%c0_9, %c0_10] : memref<16x128xf32, #tpu.memory_space<vmem>>, vector<16x128xf32>
    %9 = vector.extract_strided_slice %1 {offsets = [0, 0], sizes = [16, 1], strides = [1, 1]} : vector<16x2xf32> to vector<16x1xf32>
    %10 = vector.extract_strided_slice %2 {offsets = [0, 0], sizes = [1, 128], strides = [1, 1]} : vector<2x128xf32> to vector<1x128xf32>
    %11 = vector.broadcast %9 : vector<16x1xf32> to vector<16x128xf32>
    %12 = vector.broadcast %10 : vector<1x128xf32> to vector<16x128xf32>
    %13 = arith.mulf %11, %12 : vector<16x128xf32>
    %14 = arith.addf %8, %13 : vector<16x128xf32>
    %15 = vector.extract_strided_slice %1 {offsets = [0, 1], sizes = [16, 1], strides = [1, 1]} : vector<16x2xf32> to vector<16x1xf32>
    %16 = vector.extract_strided_slice %2 {offsets = [1, 0], sizes = [1, 128], strides = [1, 1]} : vector<2x128xf32> to vector<1x128xf32>
    %17 = vector.broadcast %15 : vector<16x1xf32> to vector<16x128xf32>
    %18 = vector.broadcast %16 : vector<1x128xf32> to vector<16x128xf32>
    %19 = arith.mulf %17, %18 : vector<16x128xf32>
    %20 = arith.addf %14, %19 : vector<16x128xf32>
    %c0_11 = arith.constant 0 : index
    %c0_12 = arith.constant 0 : index
    %c0_13 = arith.constant 0 : index
    %21 = vector.load %arg6[%c0_11, %c0_12, %c0_13] : memref<2x16x128xf32, #tpu.memory_space<vmem>>, vector<1x16x128xf32>
    %22 = vector.shape_cast %21 : vector<1x16x128xf32> to vector<16x128xf32>
    %23 = vector.shape_cast %7 : vector<16x128xf32> to vector<1x16x128xf32>
    tpu.vector_store %arg6[%c0_11, %c0_12, %c0_13], %23 {strides = array<i32>} : memref<2x16x128xf32, #tpu.memory_space<vmem>>, vector<1x16x128xf32>,
    %c1 = arith.constant 1 : index
    %c0_14 = arith.constant 0 : index
    %c0_15 = arith.constant 0 : index
    %24 = vector.load %arg6[%c1, %c0_14, %c0_15] : memref<2x16x128xf32, #tpu.memory_space<vmem>>, vector<1x16x128xf32>
    %25 = vector.shape_cast %24 : vector<1x16x128xf32> to vector<16x128xf32>
    %26 = vector.shape_cast %20 : vector<16x128xf32> to vector<1x16x128xf32>
    tpu.vector_store %arg6[%c1, %c0_14, %c0_15], %26 {strides = array<i32>} : memref<2x16x128xf32, #tpu.memory_space<vmem>>, vector<1x16x128xf32>,
    return
  }
}

</mosaic_0001>

<bundles_post_ra>
// kernel: forward.1
= control target key start
LH: loop header
LB: loop body
LE: loop exit
PB: predicated region body
PF: predicated region fallthrough
CT: control target
= control target key end

     0   :  { %v99_v0 = vmov 0   ;;  %v100_v5 = vmov 1   ;;  %v58_v6 = vlaneseq  ;;  %s181_s1 = inlined_call_operand.vmem [shape: f32[16,2], index: 1, kind: input, shape index: {}]   ;;  %s182_s0 = inlined_call_operand.vmem [shape: f32[16,1], index: 0, kind: input, shape index: {}]   ;;  %s183_s3 = inlined_call_operand.vmem [shape: f32[16,128], index: 3, kind: input, shape index: {}]   ;;  %s184_s2 = inlined_call_operand.vmem [shape: f32[2,128], index: 2, kind: input, shape index: {}]   ;;  %s185_s4 = inlined_call_operand.vmem [shape: f32[16,128], index: 4, kind: input, shape index: {}]   ;;  %s186_s6 = inlined_call_operand.vmem [shape: f32[2,16,128], index: 6, kind: output, shape index: {}]   ;;  %s187_s5 = inlined_call_operand.vmem [shape: f32[16,128], index: 5, kind: input, shape index: {}]  }
   0x1   :  { %96 = vset.pattern.permute.xlu1 %v99_v0  ;;  %95 = vset.pattern.permute.xlu0 %v99_v0  ;;  %v25_v1 = vld [vmem:[%s181_s1] sm:$0xff]  ;;  %v26_v3 = vld [vmem:[%s181_s1 + $0x8] sm:$0xff] }
   0x2   :  { %v23_v2 = vld [vmem:[%s182_s0] sm:$0xff]  ;;  %50 = vperm.xlu0 %95, %v25_v1   ;;  %v24_v4 = vld [vmem:[%s182_s0 + $0x8] sm:$0xff]  ;;  %v59_v7 = vshrl.u32 %v58_v6, 7 }
   0x3   :  { %32 = vperm.xlu1 %96, %v23_v2   ;;  %v28_v9 = vld [vmem:[%s183_s3] sm:$0xff]  ;;  %v29_v16 = vld [vmem:[%s183_s3 + $0x8] sm:$0xff] }
   0x4   :  { %v60_v8 = vsub.s32 0, %v59_v7  ;;  %v27_v10 = vld [vmem:[%s184_s2] sm:$0x3]  ;;  %v76_v17 = vsub.s32 1, %v59_v7  ;;  %v43_v20 = vld [vmem:[%s185_s4 + $0x8] sm:$0xff] }
   0x5   :  { %v42_v12 = vld [vmem:[%s185_s4] sm:$0xff]  ;;  %v47_v27 = vld [vmem:[%s187_s5 + $0x8] sm:$0xff] }
   0x6   :  { %55 = vperm.xlu0 %95, %v26_v3   ;;  %v61_v15 = vrot.slane %v27_v10, %v60_v8  ;;  %v77_v25 = vrot.slane %v27_v10, %v76_v17  ;;  %v46_v26 = vld [vmem:[%s187_s5] sm:$0xff] }
   0x7   :  { %37 = vperm.xlu1 %96, %v24_v4  }
   0xa   :  { %97 = vset.pattern.permute.xlu0 %v100_v5 }
   0xb   :  { %98 = vset.pattern.permute.xlu1 %v100_v5  ;;  %67 = vperm.xlu0 %97, %v25_v1  }
   0xc   :  { %71 = vperm.xlu1 %98, %v26_v3  }
  0x81   :  { %v51_v11 = vpop.permute.xlu0 %50 }
  0x82   :  { %v33_v13 = vpop.permute.xlu1 %32  ;;  %v62_v23 = vmul.f32 %v61_v15, %v51_v11 }
  0x83   :  { %v40_v14 = vmul.f32 %v33_v13, %v28_v9 }
  0x84   :  { %v64_v31 = vadd.f32 %v62_v23, %v46_v26 }
  0x85   :  { %v44_v18 = vadd.f32 %v42_v12, %v40_v14  ;;  %v56_v19 = vpop.permute.xlu0 %55 }
  0x86   :  { %v38_v21 = vpop.permute.xlu1 %37  ;;  %v63_v24 = vmul.f32 %v61_v15, %v56_v19 }
  0x87   :  { %82 = vst [vmem:[%s186_s6] sm:$0xff] %v44_v18  ;;  %v41_v22 = vmul.f32 %v38_v21, %v29_v16 }
  0x88   :  { %v65_v32 = vadd.f32 %v63_v24, %v47_v27 }
  0x89   :  { %v45_v28 = vadd.f32 %v43_v20, %v41_v22 }
  0x8a   :  { %v68_v29 = vpop.permute.xlu0 %67 }
  0x8b   :  { %83 = vst [vmem:[%s186_s6 + $0x8] sm:$0xff] %v45_v28  ;;  %v72_v30 = vpop.permute.xlu1 %71  ;;  %v78_v33 = vmul.f32 %v77_v25, %v68_v29 }
  0x8c   :  { %v79_v34 = vmul.f32 %v77_v25, %v72_v30 }
  0x8d   :  { %v80_v35 = vadd.f32 %v78_v33, %v64_v31 }
  0x8e   :  { %v81_v36 = vadd.f32 %v79_v34, %v65_v32 }
  0x8f   :  { %91 = vst [vmem:[%s186_s6 + $0x10] sm:$0xff] %v80_v35 }
  0x90   :  { %92 = vst [vmem:[%s186_s6 + $0x18] sm:$0xff] %v81_v36 }

</bundles_post_ra>
